<compile_context>
chip_gen: v7x
topology: tpu7x:2x2x1
jax: 0.10.0
libtpu: 0.0.40
codegen_flags: <defaults>
</compile_context>

<pallas_src>
import jax
import jax.numpy as jnp
from jax.experimental import pallas as pl
from jax.experimental.pallas import tpu as pltpu

_LANE = 128
_SUBLANE = 8


def _round_up(x, m):
    return ((x + m - 1) // m) * m


# --------------------------------------------------------------------------- #
# Kernels
# --------------------------------------------------------------------------- #
def _mlp_expand_kernel(x_ref, w1_ref, b1_ref, w2_ref, b2_ref, o_ref, acc_ref):
    """Fused (x @ W1 + b1) -> ReLU -> (@ W2) accumulated over E-chunks; +b2 at end."""
    e = pl.program_id(1)

    @pl.when(e == 0)
    def _():
        acc_ref[...] = jnp.zeros_like(acc_ref)

    # First linear restricted to this E-chunk: (tb, D) @ (D, te) -> (tb, te).
    h = jnp.dot(x_ref[...], w1_ref[...], preferred_element_type=jnp.float32)
    h = jnp.maximum(h + b1_ref[...], 0.0)  # bias + ReLU; zero-padded E cols stay 0
    # Contribution of this E-chunk to the second linear: (tb, te) @ (te, Cp).
    acc_ref[...] += jnp.dot(h.astype(w2_ref.dtype), w2_ref[...],
                            preferred_element_type=jnp.float32)

    @pl.when(e == pl.num_programs(1) - 1)
    def _():
        o_ref[...] = (acc_ref[...] + b2_ref[...]).astype(o_ref.dtype)


def _mlp_plain_kernel(x_ref, w_ref, b_ref, o_ref, acc_ref):
    """Single linear with K-reduction tiled on the second grid axis."""
    k = pl.program_id(1)

    @pl.when(k == 0)
    def _():
        acc_ref[...] = jnp.zeros_like(acc_ref)

    acc_ref[...] += jnp.dot(x_ref[...], w_ref[...],
                            preferred_element_type=jnp.float32)

    @pl.when(k == pl.num_programs(1) - 1)
    def _():
        o_ref[...] = (acc_ref[...] + b_ref[...]).astype(o_ref.dtype)


# --------------------------------------------------------------------------- #
# Wrapper
# --------------------------------------------------------------------------- #
def mlp_forward(x, params, expand_dim, *, compute_dtype=None,
                tb_max=256, red_tile_max=512):
    """Pallas forward pass for MLP.

    compute_dtype: optional dtype (e.g. jnp.bfloat16) for x and weights; the
    matmuls always accumulate in f32 and the output keeps x.dtype.
    """
    B, D = x.shape
    out_dtype = x.dtype
    cdt = x.dtype if compute_dtype is None else compute_dtype

    # Batch tiling: cdiv + zero padding (no divisibility assert).
    nb = pl.cdiv(B, tb_max)
    tb = _round_up(pl.cdiv(B, nb), _SUBLANE)
    Bp = nb * tb

    compiler_params = pltpu.CompilerParams(
        dimension_semantics=("parallel", "arbitrary"),
        vmem_limit_bytes=48 * 1024 * 1024,
    )

    if expand_dim is not None:
        w1, b1, w2, b2 = params
        E = w1.shape[1]
        C = w2.shape[1]

        # Lane-dense / tileable padded sizes.
        Cp = _round_up(C, _LANE)
        Ep0 = _round_up(E, _LANE)
        ne = pl.cdiv(Ep0, red_tile_max)
        te = _round_up(pl.cdiv(Ep0, ne), _LANE)
        Ep = ne * te

        xp = jnp.pad(x.astype(cdt), ((0, Bp - B), (0, 0)))
        w1p = jnp.pad(w1.astype(cdt), ((0, 0), (0, Ep - E)))
        b1p = jnp.pad(b1.reshape(1, E).astype(jnp.float32), ((0, 0), (0, Ep - E)))
        w2p = jnp.pad(w2.astype(cdt), ((0, Ep - E), (0, Cp - C)))
        b2p = jnp.pad(b2.reshape(1, C).astype(jnp.float32), ((0, 0), (0, Cp - C)))

        out = pl.pallas_call(
            _mlp_expand_kernel,
            out_shape=jax.ShapeDtypeStruct((Bp, Cp), out_dtype),
            grid_spec=pltpu.PrefetchScalarGridSpec(
                num_scalar_prefetch=0,
                grid=(nb, ne),
                in_specs=[
                    pl.BlockSpec((tb, D), lambda i, e: (i, 0)),   # x tile (full D)
                    pl.BlockSpec((D, te), lambda i, e: (0, e)),   # W1 E-chunk
                    pl.BlockSpec((1, te), lambda i, e: (0, e)),   # b1 E-chunk
                    pl.BlockSpec((te, Cp), lambda i, e: (e, 0)),  # W2 E-chunk
                    pl.BlockSpec((1, Cp), lambda i, e: (0, 0)),   # b2
                ],
                out_specs=pl.BlockSpec((tb, Cp), lambda i, e: (i, 0)),
                scratch_shapes=[pltpu.VMEM((tb, Cp), jnp.float32)],
            ),
            compiler_params=compiler_params,
        )(xp, w1p, b1p, w2p, b2p)
        # TODO(synk): for very large input_dim on v7x, also tile D (K of first matmul).
        return out[:B, :C]

    else:
        w, b = params
        C = w.shape[1]

        Cp = _round_up(C, _LANE)
        Dp0 = _round_up(D, _LANE)
        nk = pl.cdiv(Dp0, red_tile_max)
        tk = _round_up(pl.cdiv(Dp0, nk), _LANE)
        Dp = nk * tk

        xp = jnp.pad(x.astype(cdt), ((0, Bp - B), (0, Dp - D)))
        wp = jnp.pad(w.astype(cdt), ((0, Dp - D), (0, Cp - C)))
        bp = jnp.pad(b.reshape(1, C).astype(jnp.float32), ((0, 0), (0, Cp - C)))

        out = pl.pallas_call(
            _mlp_plain_kernel,
            out_shape=jax.ShapeDtypeStruct((Bp, Cp), out_dtype),
            grid_spec=pltpu.PrefetchScalarGridSpec(
                num_scalar_prefetch=0,
                grid=(nb, nk),
                in_specs=[
                    pl.BlockSpec((tb, tk), lambda i, k: (i, k)),  # x K-chunk
                    pl.BlockSpec((tk, Cp), lambda i, k: (k, 0)),  # W K-chunk
                    pl.BlockSpec((1, Cp), lambda i, k: (0, 0)),   # bias
                ],
                out_specs=pl.BlockSpec((tb, Cp), lambda i, k: (i, 0)),
                scratch_shapes=[pltpu.VMEM((tb, Cp), jnp.float32)],
            ),
            compiler_params=compiler_params,
        )(xp, wp, bp)
        return out[:B, :C]


# --------------------------------------------------------------------------- #
# Init + pure-JAX reference (matches PyTorch forward semantics)
# --------------------------------------------------------------------------- #
def init_mlp_params(key, input_dim, num_classes, expand_dim, dtype=jnp.float32):
    if expand_dim is not None:
        k1, k2, k3, k4 = jax.random.split(key, 4)
        bound1 = 1.0 / (input_dim ** 0.5)
        bound2 = 1.0 / (expand_dim ** 0.5)
        w1 = jax.random.uniform(k1, (input_dim, expand_dim), dtype, -bound1, bound1)
        b1 = jax.random.uniform(k2, (expand_dim,), dtype, -bound1, bound1)
        w2 = jax.random.uniform(k3, (expand_dim, num_classes), dtype, -bound2, bound2)
        b2 = jax.random.uniform(k4, (num_classes,), dtype, -bound2, bound2)
        return (w1, b1, w2, b2)
    else:
        k1, k2 = jax.random.split(key, 2)
        bound = 1.0 / (input_dim ** 0.5)
        w = jax.random.uniform(k1, (input_dim, num_classes), dtype, -bound, bound)
        b = jax.random.uniform(k2, (num_classes,), dtype, -bound, bound)
        return (w, b)


def mlp_reference(x, params, expand_dim):
    if expand_dim is not None:
        w1, b1, w2, b2 = params
        h = jnp.maximum(x @ w1 + b1, 0.0)
        return h @ w2 + b2
    else:
        w, b = params
        return x @ w + b


# --------------------------------------------------------------------------- #
# Self-test
# --------------------------------------------------------------------------- #
if __name__ == "__main__":
    key = jax.random.PRNGKey(0)
    kx, kx2, kp, kp2 = jax.random.split(key, 4)

    batch, input_dim, num_classes, expand_dim = 8, 32, 16, 64
    x = jax.random.normal(kx, (batch, input_dim), jnp.float32)

    # Case 1: expand_dim is not None (linear -> ReLU -> linear), f32.
    params = init_mlp_params(kp, input_dim, num_classes, expand_dim)
    out = jax.block_until_ready(mlp_forward(x, params, expand_dim))
    ref = mlp_reference(x, params, expand_dim)
    assert out.shape == (batch, num_classes)
    assert jnp.allclose(out, ref, atol=1e-5, rtol=1e-5)

    # Case 2: expand_dim is None (single linear), f32.
    params_p = init_mlp_params(kp2, input_dim, num_classes, None)
    out_p = jax.block_until_ready(mlp_forward(x, params_p, None))
    ref_p = mlp_reference(x, params_p, None)
    assert out_p.shape == (batch, num_classes)
    assert jnp.allclose(out_p, ref_p, atol=1e-5, rtol=1e-5)

    # Case 3: non-multiple batch (exercises cdiv + padding path).
    x_odd = jax.random.normal(kx2, (5, input_dim), jnp.float32)
    out_odd = jax.block_until_ready(mlp_forward(x_odd, params, expand_dim))
    ref_odd = mlp_reference(x_odd, params, expand_dim)
    assert out_odd.shape == (5, num_classes)
    assert jnp.allclose(out_odd, ref_odd, atol=1e-5, rtol=1e-5)

    # Case 4: bf16 compute path (f32 accumulation), loose tolerance.
    out_bf = jax.block_until_ready(
        mlp_forward(x, params, expand_dim, compute_dtype=jnp.bfloat16))
    assert out_bf.shape == (batch, num_classes)
    assert jnp.allclose(out_bf, ref, atol=0.1, rtol=0.1)

    print("KERNEL_OK")
</pallas_src>

<mosaic_0001>
module attributes {stable_mosaic.version = 11 : i64} {
  func.func @_mlp_expand_kernel(%arg0: i32, %arg1: i32, %arg2: memref<8x32xf32, #tpu.memory_space<vmem>>, %arg3: memref<32x128xf32, #tpu.memory_space<vmem>>, %arg4: memref<1x128xf32, #tpu.memory_space<vmem>>, %arg5: memref<128x128xf32, #tpu.memory_space<vmem>>, %arg6: memref<1x128xf32, #tpu.memory_space<vmem>>, %arg7: memref<8x128xf32, #tpu.memory_space<vmem>>, %arg8: memref<8x128xf32, #tpu.memory_space<vmem>>) attributes {dimension_semantics = [#tpu.dimension_semantics<parallel>, #tpu.dimension_semantics<arbitrary>], iteration_bounds = array<i64: 1, 1>, scalar_prefetch = 0 : i64, scratch_operands = 1 : i64, tpu.core_type = #tpu.core_type<tc>, window_params = [{transform_indices = @transform_0, window_bounds = array<i64: 8, 32>}, {transform_indices = @transform_1, window_bounds = array<i64: 32, 128>}, {transform_indices = @transform_2, window_bounds = array<i64: 1, 128>}, {transform_indices = @transform_3, window_bounds = array<i64: 128, 128>}, {pipeline_mode = #tpu.pipeline_mode<synchronous>, transform_indices = @transform_4, window_bounds = array<i64: 1, 128>}, {transform_indices = @transform_5, window_bounds = array<i64: 8, 128>}]} {
    %c0_i32 = arith.constant 0 : i32
    %0 = arith.cmpi eq, %arg1, %c0_i32 : i32
    %1 = arith.extui %0 : i1 to i32
    %c0_i32_0 = arith.constant 0 : i32
    %2 = arith.cmpi ne, %1, %c0_i32_0 : i32
    scf.if %2 {
      %cst_16 = arith.constant 0.000000e+00 : f32
      %19 = vector.broadcast %cst_16 : f32 to vector<8x128xf32>
      %c0_17 = arith.constant 0 : index
      %c0_18 = arith.constant 0 : index
      %20 = vector.load %arg8[%c0_17, %c0_18] : memref<8x128xf32, #tpu.memory_space<vmem>>, vector<8x128xf32>
      tpu.vector_store %arg8[%c0_17, %c0_18], %19 {strides = array<i32>} : memref<8x128xf32, #tpu.memory_space<vmem>>, vector<8x128xf32>,
    } else {
    }
    %c0 = arith.constant 0 : index
    %c0_1 = arith.constant 0 : index
    %3 = vector.load %arg2[%c0, %c0_1] : memref<8x32xf32, #tpu.memory_space<vmem>>, vector<8x32xf32>
    %c0_2 = arith.constant 0 : index
    %c0_3 = arith.constant 0 : index
    %4 = vector.load %arg3[%c0_2, %c0_3] : memref<32x128xf32, #tpu.memory_space<vmem>>, vector<32x128xf32>
    %cst = arith.constant dense<0.000000e+00> : vector<8x128xf32>
    %5 = tpu.matmul %3, %4, %cst {dimension_numbers = #tpu.dot_dimension_numbers<[1], [0], [0], [1], [0, 0, 1, 1], [], []>} : vector<8x32xf32>, vector<32x128xf32>, vector<8x128xf32> -> vector<8x128xf32>
    %c0_4 = arith.constant 0 : index
    %c0_5 = arith.constant 0 : index
    %6 = vector.load %arg4[%c0_4, %c0_5] : memref<1x128xf32, #tpu.memory_space<vmem>>, vector<1x128xf32>
    %7 = vector.broadcast %6 : vector<1x128xf32> to vector<8x128xf32>
    %8 = arith.addf %5, %7 : vector<8x128xf32>
    %cst_6 = arith.constant 0.000000e+00 : f32
    %9 = vector.broadcast %cst_6 : f32 to vector<8x128xf32>
    %10 = arith.maximumf %8, %9 : vector<8x128xf32>
    %c0_7 = arith.constant 0 : index
    %c0_8 = arith.constant 0 : index
    %11 = vector.load %arg8[%c0_7, %c0_8] : memref<8x128xf32, #tpu.memory_space<vmem>>, vector<8x128xf32>
    %c0_9 = arith.constant 0 : index
    %c0_10 = arith.constant 0 : index
    %12 = vector.load %arg5[%c0_9, %c0_10] : memref<128x128xf32, #tpu.memory_space<vmem>>, vector<128x128xf32>
    %cst_11 = arith.constant dense<0.000000e+00> : vector<8x128xf32>
    %13 = tpu.matmul %10, %12, %cst_11 {dimension_numbers = #tpu.dot_dimension_numbers<[1], [0], [0], [1], [0, 0, 1, 1], [], []>} : vector<8x128xf32>, vector<128x128xf32>, vector<8x128xf32> -> vector<8x128xf32>
    %14 = arith.addf %11, %13 : vector<8x128xf32>
    %c0_12 = arith.constant 0 : index
    %c0_13 = arith.constant 0 : index
    %15 = vector.load %arg8[%c0_12, %c0_13] : memref<8x128xf32, #tpu.memory_space<vmem>>, vector<8x128xf32>
    tpu.vector_store %arg8[%c0_12, %c0_13], %14 {strides = array<i32>} : memref<8x128xf32, #tpu.memory_space<vmem>>, vector<8x128xf32>,
    %c0_i32_14 = arith.constant 0 : i32
    %16 = arith.cmpi eq, %arg1, %c0_i32_14 : i32
    %17 = arith.extui %16 : i1 to i32
    %c0_i32_15 = arith.constant 0 : i32
    %18 = arith.cmpi ne, %17, %c0_i32_15 : i32
    scf.if %18 {
      %c0_16 = arith.constant 0 : index
      %c0_17 = arith.constant 0 : index
      %19 = vector.load %arg8[%c0_16, %c0_17] : memref<8x128xf32, #tpu.memory_space<vmem>>, vector<8x128xf32>
      %c0_18 = arith.constant 0 : index
      %c0_19 = arith.constant 0 : index
      %20 = vector.load %arg6[%c0_18, %c0_19] : memref<1x128xf32, #tpu.memory_space<vmem>>, vector<1x128xf32>
      %21 = vector.broadcast %20 : vector<1x128xf32> to vector<8x128xf32>
      %22 = arith.addf %19, %21 : vector<8x128xf32>
      %c0_20 = arith.constant 0 : index
      %c0_21 = arith.constant 0 : index
      %23 = vector.load %arg7[%c0_20, %c0_21] : memref<8x128xf32, #tpu.memory_space<vmem>>, vector<8x128xf32>
      tpu.vector_store %arg7[%c0_20, %c0_21], %22 {strides = array<i32>} : memref<8x128xf32, #tpu.memory_space<vmem>>, vector<8x128xf32>,
    } else {
    }
    return
  }
  func.func @transform_0(%arg0: i32, %arg1: i32) -> (i32, i32) {
    %c0_i32 = arith.constant 0 : i32
    %c0_i32_0 = arith.constant 0 : i32
    return %arg0, %c0_i32 : i32, i32
  }
  func.func @transform_1(%arg0: i32, %arg1: i32) -> (i32, i32) {
    %c0_i32 = arith.constant 0 : i32
    %c0_i32_0 = arith.constant 0 : i32
    return %c0_i32, %arg1 : i32, i32
  }
  func.func @transform_2(%arg0: i32, %arg1: i32) -> (i32, i32) {
    %c0_i32 = arith.constant 0 : i32
    %c0_i32_0 = arith.constant 0 : i32
    return %c0_i32, %arg1 : i32, i32
  }
  func.func @transform_3(%arg0: i32, %arg1: i32) -> (i32, i32) {
    %c0_i32 = arith.constant 0 : i32
    %c0_i32_0 = arith.constant 0 : i32
    return %arg1, %c0_i32 : i32, i32
  }
  func.func @transform_4(%arg0: i32, %arg1: i32) -> (i32, i32) {
    %c0_i32 = arith.constant 0 : i32
    %c0_i32_0 = arith.constant 0 : i32
    %c0_i32_1 = arith.constant 0 : i32
    return %c0_i32, %c0_i32_0 : i32, i32
  }
  func.func @transform_5(%arg0: i32, %arg1: i32) -> (i32, i32) {
    %c0_i32 = arith.constant 0 : i32
    %c0_i32_0 = arith.constant 0 : i32
    return %arg0, %c0_i32 : i32, i32
  }
}

</mosaic_0001>

<bundles_post_ra>
// kernel: tpu_custom_call.1
= control target key start
LH: loop header
LB: loop body
LE: loop exit
PB: predicated region body
PF: predicated region fallthrough
CT: control target
= control target key end

     0   :  { %10 = vsyncpa [#allocation4], 0  ;;  %s573_s0 = inlined_call_operand.hbm [shape: f32[8,32], index: 0, kind: input, shape index: {}]   ;;  %s574_s1 = inlined_call_operand.hbm [shape: f32[32,128], index: 1, kind: input, shape index: {}]   ;;  %s575_s2 = inlined_call_operand.vmem [shape: f32[1,128], index: 2, kind: input, shape index: {}]   ;;  %s576_s3 = inlined_call_operand.hbm [shape: f32[128,128], index: 3, kind: input, shape index: {}]   ;;  %s577_s4 = inlined_call_operand.vmem [shape: f32[1,128], index: 4, kind: input, shape index: {}]   ;;  %s578_s5 = inlined_call_operand.hbm [shape: f32[8,128], index: 5, kind: output, shape index: {}]  }
   0x1   :  { %11 = vsyncpa [#allocation7], 0 }
   0x2   :  { %12 = vsyncpa [#allocation5], 0  ;;  %s474_s18 = smov [#allocation6]   ;;  %s380_s22 = scalar_lea.hbm %s574_s1, 512 }
   0x3   :  { %s28_s19 = sshll.u32 %s474_s18, 4  ;;  %p381_p0 = scmp.ne.s32.totalorder %s574_s1, %s380_s22  ;;  %s29_s19 = int_to_ptr.vmem [resolvable:$true] %s28_s19 }
   0x4   :  { %p384_p1 = scmp.lt.u32.totalorder %s380_s22, %s574_s1 }
   0x6   :  { %p386_p2 = pnand %p384_p1, %p381_p0 }
   0x8   :  { %389 = shalt.err (!%p386_p2)
}
   0x9   :  { %s390_s27 = scalar_lea.vmem %s29_s19, 512  ;;  %p395_p4 = scmp.lt.s32.totalorder %s29_s19, %s29_s19 }
   0xa   :  { %p391_p3 = scmp.ne.s32.totalorder %s29_s19, %s390_s27  ;;  %p396_p5 = scmp.lt.s32.totalorder %s390_s27, %s390_s27 }
   0xc   :  { %p397_p6 = por %p396_p5, %p395_p4 }
   0xe   :  { %p398_p7 = pnand %p397_p6, %p391_p3 }
  0x10   :  { %401 = shalt.err (!%p398_p7)
}
  0x11   :  { %s475_s28 = smov 128   ;;  %s476_s29 = smov 8  }
  0x12   :  { %34 = dma.hbm_to_vmem [thread:$0]  %s574_s1, 512, %s29_s19, [#allocation7], %s475_s28, %s475_s28, %s476_s29  }
  0x13   :  { %s477_s7 = smov [#allocation3]   ;;  %s478_s9 = smov [#allocation8]  }
  0x14   :  { %s19_s8 = sshll.u32 %s477_s7, 4  ;;  %s42_s10 = sshll.u32 %s478_s9, 4  ;;  %s20_s8 = int_to_ptr.vmem [resolvable:$true] %s19_s8  ;;  %s43_s10 = int_to_ptr.vmem [resolvable:$true] %s42_s10 }
  0x15   :  { %s402_s13 = scalar_lea.hbm %s573_s0, 128 }
  0x16   :  { %p403_p8 = scmp.ne.s32.totalorder %s573_s0, %s402_s13  ;;  %p406_p9 = scmp.lt.u32.totalorder %s402_s13, %s573_s0 }
  0x18   :  { %p408_p10 = pnand %p406_p9, %p403_p8 }
  0x1a   :  { %411 = shalt.err (!%p408_p10)
}
  0x1b   :  { %s412_s1 = scalar_lea.vmem %s20_s8, 128  ;;  %p417_p12 = scmp.lt.s32.totalorder %s20_s8, %s20_s8 }
  0x1c   :  { %p413_p11 = scmp.ne.s32.totalorder %s20_s8, %s412_s1  ;;  %p418_p13 = scmp.lt.s32.totalorder %s412_s1, %s412_s1 }
  0x1e   :  { %p419_p0 = por %p418_p13, %p417_p12 }
  0x20   :  { %p420_p1 = pnand %p419_p0, %p413_p11 }
  0x22   :  { %423 = shalt.err (!%p420_p1)
}
  0x23   :  { %22 = dma.hbm_to_vmem [thread:$0]  %s573_s0, 128, %s20_s8, [#allocation4]  }
  0x24   :  { %s424_s22 = scalar_lea.hbm %s576_s3, 2048 }
  0x25   :  { %p425_p2 = scmp.ne.s32.totalorder %s576_s3, %s424_s22  ;;  %p428_p3 = scmp.lt.u32.totalorder %s424_s22, %s576_s3 }
  0x27   :  { %p430_p4 = pnand %p428_p3, %p425_p2 }
  0x29   :  { %433 = shalt.err (!%p430_p4)
}
  0x2a   :  { %s434_s27 = scalar_lea.vmem %s43_s10, 2048  ;;  %p439_p6 = scmp.lt.s32.totalorder %s43_s10, %s43_s10 }
  0x2b   :  { %p435_p5 = scmp.ne.s32.totalorder %s43_s10, %s434_s27  ;;  %p440_p7 = scmp.lt.s32.totalorder %s434_s27, %s434_s27 }
  0x2d   :  { %p441_p8 = por %p440_p7, %p439_p6 }
  0x2f   :  { %p442_p9 = pnand %p441_p8, %p435_p5 }
  0x31   :  { %445 = shalt.err (!%p442_p9)
}
  0x32   :  { %48 = dma.hbm_to_vmem [thread:$0]  %s576_s3, 2048, %s43_s10, [#allocation7], %s475_s28, %s475_s28, %s476_s29  }
  0x33   :  { %468 = dma.done.wait [#allocation4], 128  }
  0x34   :  { %469 = vsyncadd [#allocation4], 4294967168 }
  0x35   :  { %470 = dma.done.wait [#allocation7], 2560  }
  0x36   :  { %471 = vsyncadd [#allocation7], 4294964736  ;;  %v479_v0 = vmov 0.0|0.0   ;;  %vm480_vm0 = vmmov 0   ;;  %v481_v1 = vmov 0.0   ;;  %v66_v2 = vld [vmem:[#allocation6] sm:$0xff] }
  0x37   :  { %341 = vmatprep.subr.bf16.mxu0 %v479_v0  ;;  %303 = vmatprep.mubr.msk.f32.mxu0 %vm480_vm0, %v481_v1  ;;  %v67_v3 = vld [vmem:[#allocation6 + $0x8] sm:$0xff]  ;;  %v68_v4 = vld [vmem:[#allocation6 + $0x10] sm:$0xff]  ;;  %v69_v6 = vld [vmem:[#allocation6 + $0x18] sm:$0xff]  ;;  %vm77_vm1 = vcmask 261120   ;;  %s482_s7 = smov [#allocation9]  }
  0x38   :  { %347 = vmatprep.subr.bf16.mxu1 %v479_v0  ;;  %338 = vmatprep.mubr.msk.f32.mxu1 %vm480_vm0, %v481_v1  ;;  %v342_v5 = vpack.c.bf16 %v67_v3, %v66_v2  ;;  %v153_v7 = vld [vmem:[#allocation8] sm:$0xff]  ;;  %v154_v8 = vld [vmem:[#allocation8 + $0x8] sm:$0xff]  ;;  %v155_v9 = vld [vmem:[#allocation8 + $0x10] sm:$0xff]  ;;  %v345_v11 = vpack.c.bf16 %v69_v6, %v68_v4  ;;  %s260_s8 = sshll.u32 %s482_s7, 4  ;;  %s261_s8 = int_to_ptr.vmem [resolvable:$true] %s260_s8 }
  0x39   :  { %v156_v10 = vld [vmem:[#allocation8 + $0x18] sm:$0xff]  ;;  %v348_v12 = vpack.c.bf16 %v154_v8, %v153_v7  ;;  %v157_v14 = vld [vmem:[#allocation8 + $0x20] sm:$0xff]  ;;  %v158_v15 = vld [vmem:[#allocation8 + $0x28] sm:$0xff]  ;;  %s446_s9 = scalar_lea.vmem %s261_s8, 128  ;;  %p451_p11 = scmp.lt.s32.totalorder %s261_s8, %s261_s8 }
  0x3a   :  { %343 = vmatpush3.bf16.msra.mxu0 %v342_v5  ;;  %v351_v13 = vpack.c.bf16 %v156_v10, %v155_v9  ;;  %v65_v16 = vld [vmem:[#allocation3] sm:$0xff]  ;;  %v354_v17 = vpack.c.bf16 %v158_v15, %v157_v14  ;;  %v159_v18 = vld [vmem:[#allocation8 + $0x30] sm:$0xff]  ;;  %v161_v21 = vld [vmem:[#allocation8 + $0x40] sm:$0xff]  ;;  %p447_p10 = scmp.ne.s32.totalorder %s261_s8, %s446_s9  ;;  %p452_p12 = scmp.lt.s32.totalorder %s446_s9, %s446_s9 }
  0x3b   :  { %344 = vmatprep.subr.bf16.mxu0 %v479_v0  ;;  %349 = vmatpush3.bf16.msra.mxu1 %v348_v12  ;;  %v160_v19 = vld [vmem:[#allocation8 + $0x38] sm:$0xff]  ;;  %v162_v22 = vld [vmem:[#allocation8 + $0x48] sm:$0xff]  ;;  %v163_v24 = vld [vmem:[#allocation8 + $0x50] sm:$0xff] }
  0x3c   :  { %350 = vmatprep.subr.bf16.mxu1 %v479_v0  ;;  %v357_v20 = vpack.c.bf16 %v160_v19, %v159_v18  ;;  %v360_v23 = vpack.c.bf16 %v162_v22, %v161_v21  ;;  %v164_v25 = vld [vmem:[#allocation8 + $0x58] sm:$0xff]  ;;  %v165_v27 = vld [vmem:[#allocation8 + $0x60] sm:$0xff]  ;;  %v166_v28 = vld [vmem:[#allocation8 + $0x68] sm:$0xff]  ;;  %p453_p13 = por %p452_p12, %p451_p11 }
  0x3d   :  { %v363_v26 = vpack.c.bf16 %v164_v25, %v163_v24  ;;  %v366_v29 = vpack.c.bf16 %v166_v28, %v165_v27  ;;  %v167_v30 = vld [vmem:[#allocation8 + $0x70] sm:$0xff]  ;;  %v168_v31 = vld [vmem:[#allocation8 + $0x78] sm:$0xff] }
  0x3e   :  { %346 = vmatpush3.bf16.msra.mxu0 %v345_v11  ;;  %v369_v32 = vpack.c.bf16 %v168_v31, %v167_v30  ;;  %v270_v33 = vld [vmem:[%s575_s2] ss:$0 sm:$0xff]  ;;  %p454_p0 = pnand %p453_p13, %p447_p10 }
  0x3f   :  { %352 = vmatpush3.bf16.msra.mxu1 %v351_v13  ;;  %v272_v38 = vld [vmem:[%s577_s4] ss:$0 sm:$0xff] }
  0x40   :  { %353 = vmatprep.subr.bf16.mxu1 %v479_v0 }
  0x41   :  { %304 = vmatmul.mubr.msk.f32.vlgmr.msra.gmra.mrb[0].mxu0 %vm77_vm1, %v65_v16 }
  0x43   :  { %355 = vmatpush3.bf16.msra.mxu1 %v354_v17 }
  0x44   :  { %356 = vmatprep.subr.bf16.mxu1 %v479_v0 }
  0x47   :  { %358 = vmatpush3.bf16.msra.mxu1 %v357_v20 }
  0x48   :  { %359 = vmatprep.subr.bf16.mxu1 %v479_v0 }
  0x4b   :  { %361 = vmatpush3.bf16.msra.mxu1 %v360_v23 }
  0x4c   :  { %362 = vmatprep.subr.bf16.mxu1 %v479_v0 }
  0x4f   :  { %364 = vmatpush3.bf16.msra.mxu1 %v363_v26 }
  0x50   :  { %365 = vmatprep.subr.bf16.mxu1 %v479_v0 }
  0x53   :  { %367 = vmatpush3.bf16.msra.mxu1 %v366_v29 }
  0x54   :  { %368 = vmatprep.subr.bf16.mxu1 %v479_v0 }
  0x57   :  { %370 = vmatpush3.bf16.msra.mxu1 %v369_v32 }
 0x114   :  { %v147_v34 = vpop.f32.mrb[0].mxu0 }
 0x115   :  { %v148_v35 = vadd.f32 %v270_v33, %v147_v34  ;;  %v305_v36 = vpop.f32.mrb[1].mxu0 }
 0x117   :  { %v151_v37 = vmax.f32 %v148_v35, 0.0 }
 0x119   :  { %339 = vmatmul.mubr.f32.vlgmr.msra.gmra.mrb[0].mxu1 %v151_v37 }
 0x1ec   :  { %v235_v39 = vpop.f32.mrb[0].mxu1 }
 0x1ed   :  { %v252_v40 = vadd.f32 %v272_v38, %v235_v39  ;;  %v340_v41 = vpop.f32.mrb[1].mxu1 }
 0x1ef   :  { %253 = vst [vmem:[#allocation9] sm:$0xff] %v252_v40 }
 0x1f0   :  { %457 = shalt.err (!%p454_p0)
}
 0x1f1   :  { %s458_s11 = scalar_lea.hbm %s578_s5, 128 }
 0x1f2   :  { %p459_p1 = scmp.ne.s32.totalorder %s578_s5, %s458_s11  ;;  %p462_p2 = scmp.lt.u32.totalorder %s458_s11, %s578_s5 }
 0x1f4   :  { %p464_p3 = pnand %p462_p2, %p459_p1 }
 0x1f6   :  { %467 = shalt.err (!%p464_p3)
}
 0x1f7   :  { %263 = dma.vmem_to_hbm [thread:$0]  %s261_s8, 128, %s578_s5, [#allocation5]  }
 0x1f8   :  { %472 = dma.done.wait [#allocation5], 128  }
 0x1f9   :  { %473 = vsyncadd [#allocation5], 4294967168 }
 0x1fa   :  { %267 = vsyncpa [#allocation4], 1 }
 0x1fb   :  { %268 = vsyncpa [#allocation7], 1 }
 0x1fc   :  { %269 = vsyncpa [#allocation5], 1 }

</bundles_post_ra>
